<compile_context>
chip_gen: v5e
topology: v5e:2x2
jax: 0.10.0
libtpu: 0.0.40
codegen_flags: <defaults>
</compile_context>

<pallas_src>
import jax
import jax.numpy as jnp
from jax.experimental import pallas as pl
from jax.experimental.pallas import tpu as pltpu


def _mlp_kernel(x_ref, w1_ref, b1_ref, w2_ref, b2_ref, w3_ref, b3_ref, o_ref):
    # x_ref:  [25, TB]   (bf16 or f32)          -- batch on lanes
    # w1_ref: [64, 25], w2_ref: [16, 64], w3_ref: [3, 16]  (transposed weights)
    # b*_ref: [out_features, 1] f32
    # o_ref:  [3, TB] f32
    x = x_ref[...]

    h1 = jnp.dot(w1_ref[...], x, preferred_element_type=jnp.float32) + b1_ref[...]
    h1 = jnp.maximum(h1, 0.0)                                   # [64, TB] f32

    h2 = jnp.dot(w2_ref[...], h1.astype(w2_ref.dtype),
                 preferred_element_type=jnp.float32) + b2_ref[...]
    h2 = jnp.maximum(h2, 0.0)                                   # [16, TB] f32

    y = jnp.dot(w3_ref[...], h2.astype(w3_ref.dtype),
                preferred_element_type=jnp.float32) + b3_ref[...]   # [3, TB] f32
    o_ref[...] = y.astype(o_ref.dtype)


def _round_up(n, m):
    return (n + m - 1) // m * m


def demosaic_net_1d(x, params, *, tb=1024, use_bf16=True):
    """Forward pass of DemosaicNet1D.

    x: [B, ...] with prod(trailing dims) == 25 (e.g. [B, 5, 5]).
    params: dict with w1 [25,64], b1 [64], w2 [64,16], b2 [16], w3 [16,3], b3 [3].
    returns: [B, 3] float32.
    """
    B = x.shape[0]
    x2d = x.reshape(B, -1)                      # torch.flatten(x, start_dim=1)
    assert x2d.shape[1] == 25

    in_dtype = jnp.bfloat16 if use_bf16 else jnp.float32

    # Batch tile on the lane axis: multiple of 128, capped at `tb`.
    TB = min(_round_up(tb, 128), _round_up(max(B, 1), 128))
    Bp = _round_up(B, TB)

    # Transposed, lane-dense layout: [25, Bp], padded batch.
    xt = jnp.transpose(x2d.astype(in_dtype))                    # [25, B]
    if Bp != B:
        xt = jnp.pad(xt, ((0, 0), (0, Bp - B)))

    # Transposed weights (so kernel computes W^T @ X), biases as column vectors.
    w1t = jnp.transpose(params["w1"]).astype(in_dtype)          # [64, 25]
    w2t = jnp.transpose(params["w2"]).astype(in_dtype)          # [16, 64]
    w3t = jnp.transpose(params["w3"]).astype(in_dtype)          # [3, 16]
    b1 = params["b1"].astype(jnp.float32).reshape(-1, 1)        # [64, 1]
    b2 = params["b2"].astype(jnp.float32).reshape(-1, 1)        # [16, 1]
    b3 = params["b3"].astype(jnp.float32).reshape(-1, 1)        # [3, 1]

    grid = (Bp // TB,)

    out_t = pl.pallas_call(
        _mlp_kernel,
        out_shape=jax.ShapeDtypeStruct((3, Bp), jnp.float32),
        grid=grid,
        in_specs=[
            # x: tiled over the batch (lane) axis.
            pl.BlockSpec((25, TB), lambda i: (0, i)),
            # Weights/biases: full-extent blocks, grid-invariant -> VMEM-resident.
            pl.BlockSpec((64, 25), lambda i: (0, 0)),
            pl.BlockSpec((64, 1), lambda i: (0, 0)),
            pl.BlockSpec((16, 64), lambda i: (0, 0)),
            pl.BlockSpec((16, 1), lambda i: (0, 0)),
            pl.BlockSpec((3, 16), lambda i: (0, 0)),
            pl.BlockSpec((3, 1), lambda i: (0, 0)),
        ],
        out_specs=pl.BlockSpec((3, TB), lambda i: (0, i)),
        compiler_params=pltpu.CompilerParams(
            dimension_semantics=("parallel",),   # megacore sharding on v7x
        ),
    )(xt, w1t, b1, w2t, b2, w3t, b3)

    # Undo the transpose / padding in plain-JAX glue.
    return jnp.transpose(out_t)[:B]


def init_params(key):
    """Deterministic init mimicking PyTorch nn.Linear (uniform +-1/sqrt(fan_in))."""
    def linear(key, fan_in, fan_out):
        kw, kb = jax.random.split(key)
        bound = 1.0 / (fan_in ** 0.5)
        w = jax.random.uniform(kw, (fan_in, fan_out), jnp.float32, -bound, bound)
        b = jax.random.uniform(kb, (fan_out,), jnp.float32, -bound, bound)
        return w, b

    k1, k2, k3 = jax.random.split(key, 3)
    w1, b1 = linear(k1, 25, 64)
    w2, b2 = linear(k2, 64, 16)
    w3, b3 = linear(k3, 16, 3)
    return {"w1": w1, "b1": b1, "w2": w2, "b2": b2, "w3": w3, "b3": b3}


def _reference(x, params):
    B = x.shape[0]
    h = x.reshape(B, -1).astype(jnp.float32)
    h = jnp.maximum(h @ params["w1"] + params["b1"], 0.0)
    h = jnp.maximum(h @ params["w2"] + params["b2"], 0.0)
    return h @ params["w3"] + params["b3"]


if __name__ == "__main__":
    key = jax.random.PRNGKey(0)
    kp, kx1, kx2 = jax.random.split(key, 3)
    params = init_params(kp)

    # Small deterministic input: batch=2, a 5x5 "patch" per sample -> flattens to 25.
    x_small = jax.random.normal(kx1, (2, 5, 5), dtype=jnp.float32)
    y_small = jax.block_until_ready(demosaic_net_1d(x_small, params))
    y_small_ref = _reference(x_small, params)
    assert y_small.shape == (2, 3)
    # bf16 MXU inputs with f32 accumulation -> compare against f32 ref loosely.
    assert jnp.allclose(y_small, y_small_ref, atol=5e-2, rtol=5e-2)

    # Non-multiple-of-128 batch to exercise the padding path.
    x_odd = jax.random.normal(kx2, (300, 5, 5), dtype=jnp.float32)
    y_odd = jax.block_until_ready(demosaic_net_1d(x_odd, params))
    y_odd_ref = _reference(x_odd, params)
    assert y_odd.shape == (300, 3)
    assert jnp.allclose(y_odd, y_odd_ref, atol=5e-2, rtol=5e-2)

    print("KERNEL_OK")
</pallas_src>

<mosaic_0001>
module attributes {stable_mosaic.version = 11 : i64} {
  func.func @_mlp_kernel(%arg0: i32, %arg1: memref<25x128xbf16, #tpu.memory_space<vmem>>, %arg2: memref<64x25xbf16, #tpu.memory_space<vmem>>, %arg3: memref<64x1xf32, #tpu.memory_space<vmem>>, %arg4: memref<16x64xbf16, #tpu.memory_space<vmem>>, %arg5: memref<16x1xf32, #tpu.memory_space<vmem>>, %arg6: memref<3x16xbf16, #tpu.memory_space<vmem>>, %arg7: memref<3x1xf32, #tpu.memory_space<vmem>>, %arg8: memref<3x128xf32, #tpu.memory_space<vmem>>) attributes {dimension_semantics = [#tpu.dimension_semantics<parallel>], iteration_bounds = array<i64: 1>, scalar_prefetch = 0 : i64, scratch_operands = 0 : i64, tpu.core_type = #tpu.core_type<tc>, window_params = [{transform_indices = @transform_0, window_bounds = array<i64: 25, 128>}, {pipeline_mode = #tpu.pipeline_mode<synchronous>, transform_indices = @transform_1, window_bounds = array<i64: 64, 25>}, {pipeline_mode = #tpu.pipeline_mode<synchronous>, transform_indices = @transform_2, window_bounds = array<i64: 64, 1>}, {pipeline_mode = #tpu.pipeline_mode<synchronous>, transform_indices = @transform_3, window_bounds = array<i64: 16, 64>}, {pipeline_mode = #tpu.pipeline_mode<synchronous>, transform_indices = @transform_4, window_bounds = array<i64: 16, 1>}, {pipeline_mode = #tpu.pipeline_mode<synchronous>, transform_indices = @transform_5, window_bounds = array<i64: 3, 16>}, {pipeline_mode = #tpu.pipeline_mode<synchronous>, transform_indices = @transform_6, window_bounds = array<i64: 3, 1>}, {transform_indices = @transform_7, window_bounds = array<i64: 3, 128>}]} {
    %c0 = arith.constant 0 : index
    %c0_0 = arith.constant 0 : index
    %0 = vector.load %arg1[%c0, %c0_0] : memref<25x128xbf16, #tpu.memory_space<vmem>>, vector<25x128xbf16>
    %c0_1 = arith.constant 0 : index
    %c0_2 = arith.constant 0 : index
    %1 = vector.load %arg2[%c0_1, %c0_2] : memref<64x25xbf16, #tpu.memory_space<vmem>>, vector<64x25xbf16>
    %cst = arith.constant dense<0.000000e+00> : vector<64x128xf32>
    %2 = tpu.matmul %1, %0, %cst {dimension_numbers = #tpu.dot_dimension_numbers<[1], [0], [0], [1], [0, 0, 1, 1], [], []>} : vector<64x25xbf16>, vector<25x128xbf16>, vector<64x128xf32> -> vector<64x128xf32>
    %c0_3 = arith.constant 0 : index
    %c0_4 = arith.constant 0 : index
    %3 = vector.load %arg3[%c0_3, %c0_4] : memref<64x1xf32, #tpu.memory_space<vmem>>, vector<64x1xf32>
    %4 = vector.broadcast %3 : vector<64x1xf32> to vector<64x128xf32>
    %5 = arith.addf %2, %4 : vector<64x128xf32>
    %cst_5 = arith.constant 0.000000e+00 : f32
    %6 = vector.broadcast %cst_5 : f32 to vector<64x128xf32>
    %7 = arith.maximumf %5, %6 : vector<64x128xf32>
    %c0_6 = arith.constant 0 : index
    %c0_7 = arith.constant 0 : index
    %8 = vector.load %arg4[%c0_6, %c0_7] : memref<16x64xbf16, #tpu.memory_space<vmem>>, vector<16x64xbf16>
    %9 = arith.truncf %7 : vector<64x128xf32> to vector<64x128xbf16>
    %cst_8 = arith.constant dense<0.000000e+00> : vector<16x128xf32>
    %10 = tpu.matmul %8, %9, %cst_8 {dimension_numbers = #tpu.dot_dimension_numbers<[1], [0], [0], [1], [0, 0, 1, 1], [], []>} : vector<16x64xbf16>, vector<64x128xbf16>, vector<16x128xf32> -> vector<16x128xf32>
    %c0_9 = arith.constant 0 : index
    %c0_10 = arith.constant 0 : index
    %11 = vector.load %arg5[%c0_9, %c0_10] : memref<16x1xf32, #tpu.memory_space<vmem>>, vector<16x1xf32>
    %12 = vector.broadcast %11 : vector<16x1xf32> to vector<16x128xf32>
    %13 = arith.addf %10, %12 : vector<16x128xf32>
    %cst_11 = arith.constant 0.000000e+00 : f32
    %14 = vector.broadcast %cst_11 : f32 to vector<16x128xf32>
    %15 = arith.maximumf %13, %14 : vector<16x128xf32>
    %c0_12 = arith.constant 0 : index
    %c0_13 = arith.constant 0 : index
    %16 = vector.load %arg6[%c0_12, %c0_13] : memref<3x16xbf16, #tpu.memory_space<vmem>>, vector<3x16xbf16>
    %17 = arith.truncf %15 : vector<16x128xf32> to vector<16x128xbf16>
    %cst_14 = arith.constant dense<0.000000e+00> : vector<3x128xf32>
    %18 = tpu.matmul %16, %17, %cst_14 {dimension_numbers = #tpu.dot_dimension_numbers<[1], [0], [0], [1], [0, 0, 1, 1], [], []>} : vector<3x16xbf16>, vector<16x128xbf16>, vector<3x128xf32> -> vector<3x128xf32>
    %c0_15 = arith.constant 0 : index
    %c0_16 = arith.constant 0 : index
    %19 = vector.load %arg7[%c0_15, %c0_16] : memref<3x1xf32, #tpu.memory_space<vmem>>, vector<3x1xf32>
    %20 = vector.broadcast %19 : vector<3x1xf32> to vector<3x128xf32>
    %21 = arith.addf %18, %20 : vector<3x128xf32>
    %c0_17 = arith.constant 0 : index
    %c0_18 = arith.constant 0 : index
    %22 = vector.load %arg8[%c0_17, %c0_18] : memref<3x128xf32, #tpu.memory_space<vmem>>, vector<3x128xf32>
    tpu.vector_store %arg8[%c0_17, %c0_18], %21 {strides = array<i32>} : memref<3x128xf32, #tpu.memory_space<vmem>>, vector<3x128xf32>,
    return
  }
  func.func @transform_0(%arg0: i32) -> (i32, i32) {
    %c0_i32 = arith.constant 0 : i32
    %c0_i32_0 = arith.constant 0 : i32
    return %c0_i32, %arg0 : i32, i32
  }
  func.func @transform_1(%arg0: i32) -> (i32, i32) {
    %c0_i32 = arith.constant 0 : i32
    %c0_i32_0 = arith.constant 0 : i32
    %c0_i32_1 = arith.constant 0 : i32
    return %c0_i32, %c0_i32_0 : i32, i32
  }
  func.func @transform_2(%arg0: i32) -> (i32, i32) {
    %c0_i32 = arith.constant 0 : i32
    %c0_i32_0 = arith.constant 0 : i32
    %c0_i32_1 = arith.constant 0 : i32
    return %c0_i32, %c0_i32_0 : i32, i32
  }
  func.func @transform_3(%arg0: i32) -> (i32, i32) {
    %c0_i32 = arith.constant 0 : i32
    %c0_i32_0 = arith.constant 0 : i32
    %c0_i32_1 = arith.constant 0 : i32
    return %c0_i32, %c0_i32_0 : i32, i32
  }
  func.func @transform_4(%arg0: i32) -> (i32, i32) {
    %c0_i32 = arith.constant 0 : i32
    %c0_i32_0 = arith.constant 0 : i32
    %c0_i32_1 = arith.constant 0 : i32
    return %c0_i32, %c0_i32_0 : i32, i32
  }
  func.func @transform_5(%arg0: i32) -> (i32, i32) {
    %c0_i32 = arith.constant 0 : i32
    %c0_i32_0 = arith.constant 0 : i32
    %c0_i32_1 = arith.constant 0 : i32
    return %c0_i32, %c0_i32_0 : i32, i32
  }
  func.func @transform_6(%arg0: i32) -> (i32, i32) {
    %c0_i32 = arith.constant 0 : i32
    %c0_i32_0 = arith.constant 0 : i32
    %c0_i32_1 = arith.constant 0 : i32
    return %c0_i32, %c0_i32_0 : i32, i32
  }
  func.func @transform_7(%arg0: i32) -> (i32, i32) {
    %c0_i32 = arith.constant 0 : i32
    %c0_i32_0 = arith.constant 0 : i32
    return %c0_i32, %arg0 : i32, i32
  }
}

</mosaic_0001>

<bundles_post_ra>
// kernel: tpu_custom_call.1
= control target key start
LH: loop header
LB: loop body
LE: loop exit
PB: predicated region body
PF: predicated region fallthrough
CT: control target
= control target key end

     0   :  { %vm132_vm0 = vcmask 1043456   ;;  %vm133_vm1 = vcmask 1044480   ;;  %v336_v3 = vmov 65535   ;;  %v337_v5 = vmov 0   ;;  %s446_s0 = inlined_call_operand.vmem [shape: bf16[25,128], index: 0, kind: input, shape index: {}]   ;;  %s447_s1 = inlined_call_operand.vmem [shape: bf16[64,25], index: 1, kind: input, shape index: {}]   ;;  %s448_s2 = inlined_call_operand.vmem [shape: f32[64,1], index: 2, kind: input, shape index: {}]   ;;  %s449_s3 = inlined_call_operand.vmem [shape: bf16[16,64], index: 3, kind: input, shape index: {}]   ;;  %s450_s4 = inlined_call_operand.vmem [shape: f32[16,1], index: 4, kind: input, shape index: {}]   ;;  %s451_s5 = inlined_call_operand.vmem [shape: bf16[3,16], index: 5, kind: input, shape index: {}]   ;;  %s452_s6 = inlined_call_operand.vmem [shape: f32[3,1], index: 6, kind: input, shape index: {}]   ;;  %s453_s7 = inlined_call_operand.hbm [shape: f32[3,128], index: 7, kind: output, shape index: {}]  }
   0x1   :  { %v283_v0 = vld [vmem:[%s446_s0 + $0x8] sm:$0xf]  ;;  %v296_v1 = vld [vmem:[%s446_s0 + $0x8] sm:$0x10]  ;;  %v134_v4 = vsel %vm132_vm0, 4294967295, %v336_v3  ;;  %308 = vset.pattern.permute.xlu1 %v337_v5  ;;  %307 = vset.pattern.permute.xlu0 %v337_v5  ;;  %v46_v6 = vld [vmem:[%s448_s2 + $0x30] sm:$0xff] }
   0x2   :  { %v284_v2 = vor.u32 %v296_v1, %v283_v0  ;;  %v44_v7 = vld [vmem:[%s448_s2 + $0x20] sm:$0xff]  ;;  %v135_v8 = vsel %vm133_vm1, %v134_v4, 0  ;;  %80 = vperm.xlu0 %307, %v46_v6   ;;  %309 = vset.pattern.permute.xlu2 %v337_v5  ;;  %v42_v10 = vld [vmem:[%s448_s2 + $0x10] sm:$0xff] }
   0x3   :  { %70 = vperm.xlu1 %308, %v44_v7   ;;  %v295_v11 = vld [vmem:[%s446_s0] sm:$0xff] }
   0x4   :  { %v137_v9 = vand.u32 %v284_v2, %v135_v8 }
   0x6   :  { %302 = vmatpush.bf16.msra.mxu3 %v137_v9  ;;  %145 = vmatpush.bf16.msra.mxu0 %v137_v9 }
   0x7   :  { %12 = vsyncpa [#allocation3], 0  ;;  %60 = vperm.xlu2 %309, %v42_v10   ;;  %v47_v12 = vld [vmem:[%s448_s2 + $0x38] sm:$0xff]  ;;  %v45_v13 = vld [vmem:[%s448_s2 + $0x28] sm:$0xff]  ;;  %vm119_vm2 = vcmask 203776   ;;  %vm199_vm3 = vcmask 523264  }
   0x8   :  { %v299_v14 = vld [vmem:[%s447_s1 + $0x10] sm:$0xff]  ;;  %v297_v15 = vld [vmem:[%s447_s1] sm:$0xff]  ;;  %v43_v16 = vld [vmem:[%s448_s2 + $0x18] sm:$0xff]  ;;  %vm227_vm4 = vcmask 130048   ;;  %s252_s16 = sshll.u32 %s453_s7, 4  ;;  %s253_s16 = int_to_ptr.hbm [resolvable:$true] %s252_s16 }
   0x9   :  { %v41_v17 = vld [vmem:[%s448_s2 + $0x8] sm:$0xff]  ;;  %v40_v18 = vld [vmem:[%s448_s2] sm:$0xff]  ;;  %v300_v22 = vld [vmem:[%s447_s1 + $0x18] sm:$0xff] }
   0xa   :  { %303 = vmatpush.bf16.msra.mxu3 %v295_v11  ;;  %146 = vmatpush.bf16.msra.mxu0 %v295_v11  ;;  %v182_v19 = vld [vmem:[%s450_s4] sm:$0xff]  ;;  %v183_v20 = vld [vmem:[%s450_s4 + $0x8] sm:$0xff] }
   0xb   :  { %85 = vperm.xlu0 %307, %v47_v12   ;;  %75 = vperm.xlu1 %308, %v45_v13   ;;  %v221_v21 = vld [vmem:[%s452_s6] sm:$0x7]  ;;  %v298_v23 = vld [vmem:[%s447_s1 + $0x8] sm:$0xff] }
   0xc   :  { %v301_v60 = vld [vmem:[%s449_s3] sm:$0xff]  ;;  %s338_s3 = smov [#allocation2]  }
   0xd   :  { %287 = vmatmul.msk.bf16.vlgmr.msra.gmra.mxu3 %vm119_vm2, %v299_v14  ;;  %285 = vmatmul.msk.bf16.vlgmr.msra.gmra.mxu0 %vm119_vm2, %v297_v15  ;;  %v219_v6 = vld [vmem:[%s451_s5] sm:$0x3]  ;;  %s250_s13 = sshll.u32 %s338_s3, 4  ;;  %s251_s13 = int_to_ptr.vmem [resolvable:$true] %s250_s13 }
   0xf   :  { %65 = vperm.xlu2 %309, %v43_v16  }
  0x13   :  { %55 = vperm.xlu1 %308, %v41_v17   ;;  %50 = vperm.xlu0 %307, %v40_v18  }
  0x17   :  { %186 = vperm.xlu2 %309, %v182_v19  }
  0x1b   :  { %191 = vperm.xlu0 %307, %v183_v20   ;;  %224 = vperm.xlu1 %308, %v221_v21  }
  0x1d   :  { %288 = vmatmul.msk.bf16.gmra.mxu3 %vm119_vm2, %v300_v22  ;;  %286 = vmatmul.msk.bf16.gmra.mxu0 %vm119_vm2, %v298_v23 }
  0x61   :  { %v61_v32 = vpop.permute.xlu2 %60 }
  0x69   :  { %v66_v43 = vpop.permute.xlu2 %65 }
  0x71   :  { %v187_v62 = vpop.permute.xlu2 %186 }
  0x74   :  { %v81_v28 = vpop.permute.xlu0 %80 }
  0x75   :  { %v71_v29 = vpop.permute.xlu1 %70 }
  0x7d   :  { %v86_v33 = vpop.permute.xlu0 %85  ;;  %v76_v34 = vpop.permute.xlu1 %75 }
  0x85   :  { %v51_v44 = vpop.permute.xlu0 %50  ;;  %v56_v49 = vpop.permute.xlu1 %55 }
  0x8a   :  { %v148_v24 = vpop.f32.mrf.mxu0 }
  0x8b   :  { %v149_v51 = vadd.f32 %v148_v24, %v51_v44 }
  0x8d   :  { %v168_v56 = vmax.f32 %v149_v51, 0.0  ;;  %v192_v0 = vpop.permute.xlu0 %191  ;;  %v225_v7 = vpop.permute.xlu1 %224 }
  0x90   :  { %v158_v25 = vpop.f32.mrf.mxu3 }
  0x91   :  { %v159_v40 = vadd.f32 %v158_v25, %v71_v29 }
  0x92   :  { %v150_v26 = vpop.f32.mrf.mxu0 }
  0x93   :  { %v172_v50 = vmax.f32 %v159_v40, 0.0  ;;  %v151_v52 = vadd.f32 %v150_v26, %v56_v49 }
  0x95   :  { %v169_v57 = vmax.f32 %v151_v52, 0.0 }
  0x97   :  { %v178_v59 = vpack.c.bf16 %v169_v57, %v168_v56 }
  0x98   :  { %v160_v27 = vpop.f32.mrf.mxu3 }
  0x99   :  { %v161_v37 = vadd.f32 %v160_v27, %v76_v34 }
  0x9a   :  { %v153_v30 = vpop.f32.mrf.mxu0 }
  0x9b   :  { %v173_v45 = vmax.f32 %v161_v37, 0.0  ;;  %v154_v46 = vadd.f32 %v153_v30, %v61_v32 }
  0x9d   :  { %v170_v53 = vmax.f32 %v154_v46, 0.0  ;;  %v180_v55 = vpack.c.bf16 %v173_v45, %v172_v50 }
  0xa0   :  { %v163_v31 = vpop.f32.mrf.mxu3 }
  0xa1   :  { %v164_v35 = vadd.f32 %v163_v31, %v81_v28 }
  0xa2   :  { %v155_v39 = vpop.f32.mrf.mxu0 }
  0xa3   :  { %v174_v41 = vmax.f32 %v164_v35, 0.0  ;;  %v156_v47 = vadd.f32 %v155_v39, %v66_v43 }
  0xa5   :  { %v171_v54 = vmax.f32 %v156_v47, 0.0 }
  0xa7   :  { %v179_v58 = vpack.c.bf16 %v171_v54, %v170_v53 }
  0xa8   :  { %v165_v36 = vpop.f32.mrf.mxu3 }
  0xa9   :  { %v166_v38 = vadd.f32 %v165_v36, %v86_v33 }
  0xab   :  { %v175_v42 = vmax.f32 %v166_v38, 0.0 }
  0xad   :  { %v181_v48 = vpack.c.bf16 %v175_v42, %v174_v41 }
  0xaf   :  { %207 = vmatpush.bf16.msra.mxu1 %v181_v48 }
  0xb3   :  { %208 = vmatpush.bf16.msra.mxu1 %v180_v55 }
  0xb7   :  { %209 = vmatpush.bf16.msra.mxu1 %v179_v58 }
  0xbb   :  { %210 = vmatpush.bf16.msra.mxu1 %v178_v59 }
  0xbe   :  { %293 = vmatmul.msk.bf16.vlgmr.msra.gmra.mxu1 %vm199_vm3, %v301_v60 }
 0x13b   :  { %v212_v61 = vpop.f32.mrf.mxu1 }
 0x13c   :  { %v213_v63 = vadd.f32 %v212_v61, %v187_v62 }
 0x13e   :  { %v217_v3 = vmax.f32 %v213_v63, 0.0 }
 0x143   :  { %v214_v1 = vpop.f32.mrf.mxu1 }
 0x144   :  { %v215_v2 = vadd.f32 %v214_v1, %v192_v0 }
 0x146   :  { %v218_v4 = vmax.f32 %v215_v2, 0.0 }
 0x148   :  { %v220_v5 = vpack.c.bf16 %v218_v4, %v217_v3 }
 0x14a   :  { %238 = vmatpush.bf16.msra.mxu2 %v220_v5 }
 0x14d   :  { %294 = vmatmul.msk.bf16.vlgmr.msra.gmra.mxu2 %vm227_vm4, %v219_v6 }
 0x1d0   :  { %v240_v8 = vpop.f32.mrf.mxu2 }
 0x1d1   :  { %v241_v9 = vadd.f32 %v240_v8, %v225_v7 }
 0x1d3   :  { %244 = vst [vmem:[#allocation2] sm:$0x7] %v241_v9 }
 0x1d4   :  { %255 = dma.vmem_to_hbm [thread:$0]  %s251_s13, 64, %s253_s16, [#allocation3]  }
 0x1d8   :  { %v242_v10 = vpop.f32.mrf.mxu2 }
 0x1d9   :  { %334 = dma.done.wait [#allocation3], 64  }
 0x1da   :  { %335 = vsyncadd [#allocation3], 4294967232 }
 0x1db   :  { %260 = vsyncpa [#allocation3], 1 }

</bundles_post_ra>
